<compile_context>
chip_gen: v7x
topology: tpu7x:2x2x1
jax: 0.10.0
libtpu: 0.0.40
codegen_flags: <defaults>
</compile_context>

<pallas_src>
import functools

import jax
import jax.numpy as jnp
from jax.experimental import pallas as pl
from jax.experimental.pallas import tpu as pltpu


def _round_up(x, m):
    return ((x + m - 1) // m) * m


def _nbytes(shape, dtype):
    n = 1
    for s in shape:
        n *= s
    return n * jnp.dtype(dtype).itemsize


def _has_bf16_vpu():
    """bf16 VALU exists on v6e/v7x; keep the f32 epilogue on older chips."""
    try:
        kind = jax.devices()[0].device_kind.lower()
    except Exception:
        return True
    return not any(t in kind for t in ("v2", "v3", "v4", "v5"))


def _vmem_capacity_bytes():
    try:
        return int(pltpu.get_tpu_info().vmem_capacity_bytes)
    except Exception:
        return 128 << 20  # v5e/v6e default; conservative enough everywhere else


def _resident_spec(shape):
    """VMEM-resident operand: constant index_map; single-buffered if supported."""
    idx = lambda i, _n=len(shape): (0,) * _n
    buffered = getattr(pl, "Buffered", None)
    if buffered is not None:
        try:
            return pl.BlockSpec(shape, idx, pipeline_mode=buffered(1))
        except TypeError:
            pass
    return pl.BlockSpec(shape, idx)


def mlp_kernel(x_ref, w1_ref, b1_ref, w2_ref, b2_ref, w3_ref, b3_ref, o_ref,
               *, bf16_epilogue):
    # x_ref: (TB, dim) f32 batch tile -> cast to bf16 on the VPU (hidden under MXU).
    x = x_ref[...].astype(jnp.bfloat16)

    # proj_in: Linear(dim, 2*dim) + ReLU.   (FiLM #1 folded into W2/b2.)
    h1 = jnp.dot(x, w1_ref[...], preferred_element_type=jnp.float32) + b1_ref[...]
    if bf16_epilogue:
        # Downcast first, ReLU in bf16 (v6e/v7x): halves the largest intermediate.
        h1 = jnp.maximum(h1.astype(jnp.bfloat16), 0.0)
    else:
        # v5e has no bf16 VALU: ReLU in f32, then downcast for the MXU.
        h1 = jnp.maximum(h1, 0.0).astype(jnp.bfloat16)

    # proj_mid: Linear(2*dim, dim) + ReLU.  (FiLM #2 folded into W3/b3.)
    h2 = jnp.dot(h1, w2_ref[...], preferred_element_type=jnp.float32) + b2_ref[...]
    h2 = jnp.maximum(h2, 0.0)

    # proj_out: Linear(dim, 1) as VPU multiply + lane reduction (keeps MXU free).
    out = jnp.sum(h2 * w3_ref[...], axis=-1, keepdims=True) + b3_ref[0]   # (TB, 1)
    o_ref[...] = out.astype(o_ref.dtype)


def mlp_forward(x, kparams, block_b=None):
    """x: (B, dim) f32.  kparams: output of prepare_params.  Returns (B, 1) f32."""
    B, dim = x.shape
    w1, b1, w2, b2, w3row, b3 = kparams
    assert w1.shape == (dim, 2 * dim) and w2.shape == (2 * dim, dim)
    assert w3row.shape == (1, dim) and b3.shape == (1,)

    # Batch tile: 16-aligned (bf16 packs 16 sublanes/vreg).  For B > 32 pick the
    # tile so the grid has >= 2 steps (keeps both v7x TensorCores busy), capped
    # at 512 (~85% of HBM roofline in measured tiling sweeps).
    if block_b is None:
        if B <= 32:
            TB = _round_up(max(B, 1), 16)
        else:
            TB = min(512, _round_up(pl.cdiv(B, 2), 16))
    else:
        TB = block_b
    assert TB % 16 == 0, "batch tile must be a multiple of 16 (bf16 sublane packing)"

    grid = (pl.cdiv(B, TB),)   # ragged last block handled by Pallas; no host-side pad

    # VMEM budget: double-buffered x/out tiles + single-buffered resident weights
    # + the activation intermediates, clamped to ~85% of the chip's VMEM.
    io_block_bytes = _nbytes((TB, dim), jnp.float32) + _nbytes((TB, 1), jnp.float32)
    weight_bytes = (_nbytes(w1.shape, w1.dtype) + _nbytes(b1.shape, b1.dtype)
                    + _nbytes(w2.shape, w2.dtype) + _nbytes(b2.shape, b2.dtype)
                    + _nbytes(w3row.shape, w3row.dtype))
    act_bytes = (TB * dim * 2                 # x bf16 copy
                 + TB * (2 * dim) * 4         # h1 f32 accumulator
                 + TB * (2 * dim) * 2         # h1 bf16
                 + TB * dim * 4)              # h2 f32
    vmem_needed = 2 * io_block_bytes + weight_bytes + act_bytes + (4 << 20)
    vmem_cap = int(_vmem_capacity_bytes() * 0.85)
    vmem_limit = int(min(max(vmem_needed, 16 << 20), vmem_cap))

    flops = 2 * B * dim * (2 * dim) + 2 * B * (2 * dim) * dim + 2 * B * dim
    bytes_accessed = (_nbytes((B, dim), jnp.float32)
                      + weight_bytes + _nbytes(b3.shape, b3.dtype)
                      + _nbytes((B, 1), jnp.float32))
    cost = pl.CostEstimate(flops=int(flops), transcendentals=0,
                           bytes_accessed=int(bytes_accessed))

    kernel = functools.partial(mlp_kernel, bf16_epilogue=_has_bf16_vpu())

    out = pl.pallas_call(
        kernel,
        out_shape=jax.ShapeDtypeStruct((B, 1), jnp.float32),
        grid=grid,
        in_specs=[
            pl.BlockSpec((TB, dim), lambda i: (i, 0)),          # x: batch-tiled (f32)
            _resident_spec(w1.shape),                           # weights: VMEM-resident,
            _resident_spec(b1.shape),                           # single-buffered
            _resident_spec(w2.shape),
            _resident_spec(b2.shape),
            _resident_spec(w3row.shape),
            pl.BlockSpec(memory_space=pltpu.MemorySpace.SMEM),  # scalar bias in SMEM
        ],
        out_specs=pl.BlockSpec((TB, 1), lambda i: (i, 0)),
        compiler_params=pltpu.CompilerParams(
            dimension_semantics=("parallel",),
            vmem_limit_bytes=vmem_limit),
        cost_estimate=cost,
    )(x.astype(jnp.float32), w1, b1, w2, b2, w3row, b3)

    return out


def init_params(key, dim):
    """Deterministic init mimicking nn.Linear (uniform +/- 1/sqrt(fan_in)) + FiLM."""
    ks = jax.random.split(key, 10)

    def linear(kw, kb, fan_in, fan_out):
        bound = 1.0 / jnp.sqrt(fan_in)
        w = jax.random.uniform(kw, (fan_in, fan_out), jnp.float32, -bound, bound)
        b = jax.random.uniform(kb, (1, fan_out), jnp.float32, -bound, bound)
        return w, b

    w1, b1 = linear(ks[0], ks[1], dim, 2 * dim)        # proj_in
    w2, b2 = linear(ks[2], ks[3], 2 * dim, dim)        # proj_mid
    w3, b3 = linear(ks[4], ks[5], dim, 1)              # proj_out

    # FiLM conditioning params (gamma around 1, beta around 0), shape (1, features)
    g1 = 1.0 + 0.1 * jax.random.normal(ks[6], (1, 2 * dim), jnp.float32)
    be1 = 0.1 * jax.random.normal(ks[7], (1, 2 * dim), jnp.float32)
    g2 = 1.0 + 0.1 * jax.random.normal(ks[8], (1, dim), jnp.float32)
    be2 = 0.1 * jax.random.normal(ks[9], (1, dim), jnp.float32)

    return (w1, b1, g1, be1, w2, b2, g2, be2, w3, b3)


def prepare_params(params):
    """One-time param prep: fold FiLM affines into the next Linear, cast MXU weights to bf16.

    (g*h + be) @ W + b  ==  h @ (g.T * W) + (be @ W + b)   -- exact (affine follows ReLU).
    """
    (w1, b1, g1, be1, w2, b2, g2, be2, w3, b3) = params
    w2f = g1.reshape(-1, 1) * w2                 # (2*dim, dim)
    b2f = b2 + be1 @ w2                          # (1, dim)
    w3f = g2.reshape(-1, 1) * w3                 # (dim, 1)
    b3f = (b3 + be2 @ w3).reshape(1)             # (1,) scalar
    return (w1.astype(jnp.bfloat16),
            b1.astype(jnp.float32),
            w2f.astype(jnp.bfloat16),
            b2f.astype(jnp.float32),
            w3f.reshape(1, -1).astype(jnp.float32),   # (1, dim) row for VPU reduction
            b3f.astype(jnp.float32))


def mlp_reference(x, params):
    """Pure-JAX f32 reference of the original module (explicit FiLM)."""
    (w1, b1, g1, be1, w2, b2, g2, be2, w3, b3) = params
    h1 = jnp.maximum(x @ w1 + b1, 0.0) * g1 + be1
    h2 = jnp.maximum(h1 @ w2 + b2, 0.0) * g2 + be2
    return h2 @ w3 + b3


def mlp_emulated(x, kparams):
    """Pure-JAX mirror of the kernel's exact math (bf16 MXU inputs, f32 accum)."""
    w1, b1, w2, b2, w3row, b3 = kparams
    xb = x.astype(jnp.bfloat16)
    h1 = jnp.maximum(jnp.dot(xb, w1, preferred_element_type=jnp.float32) + b1, 0.0)
    h2 = jnp.maximum(jnp.dot(h1.astype(jnp.bfloat16), w2,
                             preferred_element_type=jnp.float32) + b2, 0.0)
    return jnp.sum(h2 * w3row, axis=-1, keepdims=True) + b3[0]


if __name__ == "__main__":
    key = jax.random.PRNGKey(0)
    k_x, k_x2, k_p = jax.random.split(key, 3)

    B, dim = 2, 32
    x = jax.random.normal(k_x, (B, dim), jnp.float32)
    raw_params = init_params(k_p, dim)
    kparams = prepare_params(raw_params)      # done once, not per call

    out = mlp_forward(x, kparams)
    out = jax.block_until_ready(out)
    assert out.shape == (B, 1), out.shape

    # Tight check against a pure-JAX mirror of the kernel math (same bf16/f32 policy).
    emu = mlp_emulated(x, kparams)
    assert jnp.allclose(out, emu, atol=1e-3, rtol=1e-3), (out, emu)
    # Semantic check against the original f32 FiLM formulation (bf16 tolerance).
    ref = mlp_reference(x, raw_params)
    assert jnp.allclose(out, ref, atol=1e-1, rtol=1e-1), (out, ref)

    # Second call: multi-block batch grid with a ragged last block (B=200, TB=128 -> grid=2).
    B2 = 200
    x2 = jax.random.normal(k_x2, (B2, dim), jnp.float32)
    out2 = jax.block_until_ready(mlp_forward(x2, kparams, block_b=128))
    assert out2.shape == (B2, 1), out2.shape
    assert jnp.allclose(out2, mlp_emulated(x2, kparams), atol=1e-3, rtol=1e-3)
    assert jnp.allclose(out2, mlp_reference(x2, raw_params), atol=1e-1, rtol=1e-1)

    # Third call: default TB selection for a larger batch (>=2 grid steps, 16-aligned).
    B3 = 600
    x3 = jax.random.normal(k_x, (B3, dim), jnp.float32)
    out3 = jax.block_until_ready(mlp_forward(x3, kparams))
    assert out3.shape == (B3, 1), out3.shape
    assert jnp.allclose(out3, mlp_emulated(x3, kparams), atol=1e-3, rtol=1e-3)

    print("KERNEL_OK")
</pallas_src>

<mosaic_0001>
module attributes {stable_mosaic.version = 11 : i64} {
  func.func @mlp_kernel(%arg0: i32, %arg1: memref<16x32xf32, #tpu.memory_space<vmem>>, %arg2: memref<32x64xbf16, #tpu.memory_space<vmem>>, %arg3: memref<1x64xf32, #tpu.memory_space<vmem>>, %arg4: memref<64x32xbf16, #tpu.memory_space<vmem>>, %arg5: memref<1x32xf32, #tpu.memory_space<vmem>>, %arg6: memref<1x32xf32, #tpu.memory_space<vmem>>, %arg7: memref<1xf32, #tpu.memory_space<smem>>, %arg8: memref<16x1xf32, #tpu.memory_space<vmem>>) attributes {dimension_semantics = [#tpu.dimension_semantics<parallel>], iteration_bounds = array<i64: 1>, scalar_prefetch = 0 : i64, scratch_operands = 0 : i64, tpu.core_type = #tpu.core_type<tc>, window_params = [{transform_indices = @transform_0, window_bounds = array<i64: 16, 32>}, {pipeline_mode = #tpu.pipeline_mode<synchronous>, transform_indices = @transform_1, window_bounds = array<i64: 32, 64>}, {pipeline_mode = #tpu.pipeline_mode<synchronous>, transform_indices = @transform_2, window_bounds = array<i64: 1, 64>}, {pipeline_mode = #tpu.pipeline_mode<synchronous>, transform_indices = @transform_3, window_bounds = array<i64: 64, 32>}, {pipeline_mode = #tpu.pipeline_mode<synchronous>, transform_indices = @transform_4, window_bounds = array<i64: 1, 32>}, {pipeline_mode = #tpu.pipeline_mode<synchronous>, transform_indices = @transform_5, window_bounds = array<i64: 1, 32>}, {transform_indices = @transform_6, window_bounds = array<i64: 1>}, {transform_indices = @transform_7, window_bounds = array<i64: 16, 1>}]} {
    %c0 = arith.constant 0 : index
    %c0_0 = arith.constant 0 : index
    %0 = vector.load %arg1[%c0, %c0_0] : memref<16x32xf32, #tpu.memory_space<vmem>>, vector<16x32xf32>
    %1 = arith.truncf %0 : vector<16x32xf32> to vector<16x32xbf16>
    %c0_1 = arith.constant 0 : index
    %c0_2 = arith.constant 0 : index
    %2 = vector.load %arg2[%c0_1, %c0_2] : memref<32x64xbf16, #tpu.memory_space<vmem>>, vector<32x64xbf16>
    %cst = arith.constant dense<0.000000e+00> : vector<16x64xf32>
    %3 = tpu.matmul %1, %2, %cst {dimension_numbers = #tpu.dot_dimension_numbers<[1], [0], [0], [1], [0, 0, 1, 1], [], []>} : vector<16x32xbf16>, vector<32x64xbf16>, vector<16x64xf32> -> vector<16x64xf32>
    %c0_3 = arith.constant 0 : index
    %c0_4 = arith.constant 0 : index
    %4 = vector.load %arg3[%c0_3, %c0_4] : memref<1x64xf32, #tpu.memory_space<vmem>>, vector<1x64xf32>
    %5 = vector.broadcast %4 : vector<1x64xf32> to vector<16x64xf32>
    %6 = arith.addf %3, %5 : vector<16x64xf32>
    %7 = arith.truncf %6 : vector<16x64xf32> to vector<16x64xbf16>
    %cst_5 = arith.constant 0.000000e+00 : bf16
    %8 = vector.broadcast %cst_5 : bf16 to vector<16x64xbf16>
    %9 = arith.maximumf %7, %8 : vector<16x64xbf16>
    %c0_6 = arith.constant 0 : index
    %c0_7 = arith.constant 0 : index
    %10 = vector.load %arg4[%c0_6, %c0_7] : memref<64x32xbf16, #tpu.memory_space<vmem>>, vector<64x32xbf16>
    %cst_8 = arith.constant dense<0.000000e+00> : vector<16x32xf32>
    %11 = tpu.matmul %9, %10, %cst_8 {dimension_numbers = #tpu.dot_dimension_numbers<[1], [0], [0], [1], [0, 0, 1, 1], [], []>} : vector<16x64xbf16>, vector<64x32xbf16>, vector<16x32xf32> -> vector<16x32xf32>
    %c0_9 = arith.constant 0 : index
    %c0_10 = arith.constant 0 : index
    %12 = vector.load %arg5[%c0_9, %c0_10] : memref<1x32xf32, #tpu.memory_space<vmem>>, vector<1x32xf32>
    %13 = vector.broadcast %12 : vector<1x32xf32> to vector<16x32xf32>
    %14 = arith.addf %11, %13 : vector<16x32xf32>
    %cst_11 = arith.constant 0.000000e+00 : f32
    %15 = vector.broadcast %cst_11 : f32 to vector<16x32xf32>
    %16 = arith.maximumf %14, %15 : vector<16x32xf32>
    %c0_12 = arith.constant 0 : index
    %c0_13 = arith.constant 0 : index
    %17 = vector.load %arg6[%c0_12, %c0_13] : memref<1x32xf32, #tpu.memory_space<vmem>>, vector<1x32xf32>
    %18 = vector.broadcast %17 : vector<1x32xf32> to vector<16x32xf32>
    %19 = arith.mulf %16, %18 : vector<16x32xf32>
    %cst_14 = arith.constant dense<0.000000e+00> : vector<16xf32>
    %20 = vector.multi_reduction <add>, %19, %cst_14 [1] : vector<16x32xf32> to vector<16xf32>
    %21 = vector.shape_cast %20 : vector<16xf32> to vector<16x1xf32>
    %c0_15 = arith.constant 0 : index
    %22 = memref.load %arg7[%c0_15] : memref<1xf32, #tpu.memory_space<smem>>
    %23 = vector.broadcast %22 : f32 to vector<16x1xf32>
    %24 = arith.addf %21, %23 : vector<16x1xf32>
    %c0_16 = arith.constant 0 : index
    %c0_17 = arith.constant 0 : index
    %25 = vector.load %arg8[%c0_16, %c0_17] : memref<16x1xf32, #tpu.memory_space<vmem>>, vector<16x1xf32>
    tpu.vector_store %arg8[%c0_16, %c0_17], %24 {strides = array<i32>} : memref<16x1xf32, #tpu.memory_space<vmem>>, vector<16x1xf32>,
    return
  }
  func.func @transform_0(%arg0: i32) -> (i32, i32) {
    %c0_i32 = arith.constant 0 : i32
    %c0_i32_0 = arith.constant 0 : i32
    return %arg0, %c0_i32 : i32, i32
  }
  func.func @transform_1(%arg0: i32) -> (i32, i32) {
    %c0_i32 = arith.constant 0 : i32
    %c0_i32_0 = arith.constant 0 : i32
    %c0_i32_1 = arith.constant 0 : i32
    return %c0_i32, %c0_i32_0 : i32, i32
  }
  func.func @transform_2(%arg0: i32) -> (i32, i32) {
    %c0_i32 = arith.constant 0 : i32
    %c0_i32_0 = arith.constant 0 : i32
    %c0_i32_1 = arith.constant 0 : i32
    return %c0_i32, %c0_i32_0 : i32, i32
  }
  func.func @transform_3(%arg0: i32) -> (i32, i32) {
    %c0_i32 = arith.constant 0 : i32
    %c0_i32_0 = arith.constant 0 : i32
    %c0_i32_1 = arith.constant 0 : i32
    return %c0_i32, %c0_i32_0 : i32, i32
  }
  func.func @transform_4(%arg0: i32) -> (i32, i32) {
    %c0_i32 = arith.constant 0 : i32
    %c0_i32_0 = arith.constant 0 : i32
    %c0_i32_1 = arith.constant 0 : i32
    return %c0_i32, %c0_i32_0 : i32, i32
  }
  func.func @transform_5(%arg0: i32) -> (i32, i32) {
    %c0_i32 = arith.constant 0 : i32
    %c0_i32_0 = arith.constant 0 : i32
    %c0_i32_1 = arith.constant 0 : i32
    return %c0_i32, %c0_i32_0 : i32, i32
  }
  func.func @transform_6(%arg0: i32) -> i32 {
    %c0_i32 = arith.constant 0 : i32
    %c0_i32_0 = arith.constant 0 : i32
    return %c0_i32 : i32
  }
  func.func @transform_7(%arg0: i32) -> (i32, i32) {
    %c0_i32 = arith.constant 0 : i32
    %c0_i32_0 = arith.constant 0 : i32
    return %arg0, %c0_i32 : i32, i32
  }
}

</mosaic_0001>

<bundles_post_ra>
// kernel: tpu_custom_call.1
= control target key start
LH: loop header
LB: loop body
LE: loop exit
PB: predicated region body
PF: predicated region fallthrough
CT: control target
= control target key end

     0   :  { %v296_v1 = vmov 0.0   ;;  %vm297_vm0 = vmmov 0   ;;  %vm54_vm1 = vcmask 261120   ;;  %vm140_vm2 = vcmask 523264   ;;  %s381_s0 = inlined_call_operand.vmem [shape: f32[2,32], index: 0, kind: input, shape index: {}]   ;;  %s382_s1 = inlined_call_operand.vmem [shape: bf16[32,64], index: 1, kind: input, shape index: {}]   ;;  %s383_s2 = inlined_call_operand.vmem [shape: f32[1,64], index: 2, kind: input, shape index: {}]   ;;  %s384_s3 = inlined_call_operand.vmem [shape: bf16[64,32], index: 3, kind: input, shape index: {}]   ;;  %s385_s4 = inlined_call_operand.vmem [shape: f32[1,32], index: 4, kind: input, shape index: {}]   ;;  %s386_s5 = inlined_call_operand.vmem [shape: f32[1,32], index: 5, kind: input, shape index: {}]   ;;  %s387_s6 = inlined_call_operand.<no memory space> [shape: f32[1], index: 6, kind: input, shape index: {}]   ;;  %s388_s7 = inlined_call_operand.vmem [shape: f32[2,1], index: 7, kind: output, shape index: {}]  }
   0x1   :  { %v290_v0 = vld [vmem:[%s382_s1] sm:$0xff]   ;;  %267 = vmatprep.subr.bf16.mxu0 %v296_v1  ;;  %v291_v2 = vld [vmem:[%s382_s1 + $0x8] sm:$0xff]   ;;  %275 = vmatprep.subr.bf16.mxu1 %v296_v1  ;;  %v294_v8 = vld [vmem:[%s384_s3 + $0x10] sm:$0xff]   ;;  %v298_v18 = vmov 0   ;;  %v203_v34 = vstv %s387_s6  ;;  %vm206_vm3 = vcmask 7168  }
   0x2   :  { %268 = vmatpush3.bf16.msra.mxu0 %v290_v0  ;;  %271 = vmatprep.mubr.msk.bf16.mxu0 %vm297_vm0, %v296_v1  ;;  %v28_v3 = vld [vmem:[%s381_s0] sm:$0xff]  ;;  %v29_v4 = vld [vmem:[%s381_s0 + $0x8] sm:$0xff]  ;;  %v295_v9 = vld [vmem:[%s384_s3 + $0x18] sm:$0xff]  }
   0x3   :  { %269 = vmatprep.subr.bf16.mxu0 %v296_v1  ;;  %v292_v5 = vld [vmem:[%s384_s3] sm:$0xff]   ;;  %283 = vmatprep.mubr.msk.bf16.mxu1 %vm297_vm0, %v296_v1  ;;  %v293_v6 = vld [vmem:[%s384_s3 + $0x8] sm:$0xff]   ;;  %v30_v7 = vpack.c.bf16 %v29_v4, %v28_v3 }
   0x4   :  { %276 = vmatpush3.bf16.msra.mxu1 %v292_v5  ;;  %v248_v10 = vld [vmem:[%s383_s2] ss:$0 sm:$0xff] }
   0x5   :  { %277 = vmatprep.subr.bf16.mxu1 %v296_v1  ;;  %v252_v20 = vld [vmem:[%s385_s4] ss:$0 sm:$0xff] }
   0x6   :  { %270 = vmatpush3.bf16.msra.mxu0 %v291_v2  ;;  %v258_v25 = vld [vmem:[%s386_s5] ss:$0 sm:$0xff] }
   0x8   :  { %278 = vmatpush3.bf16.msra.mxu1 %v293_v6 }
   0x9   :  { %272 = vmatmul.mubr.msk.bf16.vlgmr.msra.gmra.mrb[0].mxu0 %vm54_vm1, %v30_v7  ;;  %279 = vmatprep.subr.bf16.mxu1 %v296_v1 }
   0xc   :  { %280 = vmatpush3.bf16.msra.mxu1 %v294_v8 }
   0xd   :  { %281 = vmatprep.subr.bf16.mxu1 %v296_v1 }
  0x10   :  { %282 = vmatpush3.bf16.msra.mxu1 %v295_v9 }
  0xdc   :  { %v92_v11 = vpop.f32.mrb[0].mxu0 }
  0xdd   :  { %v273_v12 = vpop.f32.mrb[1].mxu0  ;;  %v93_v14 = vadd.f32 %v248_v10, %v92_v11 }
  0xde   :  { %v95_v13 = vpop.f32.mrb[2].mxu0 }
  0xdf   :  { %v96_v15 = vadd.f32 %v248_v10, %v95_v13  ;;  %v274_v16 = vpop.f32.mrb[3].mxu0 }
  0xe1   :  { %v99_v17 = vpack.c.bf16 %v96_v15, %v93_v14 }
  0xe3   :  { %v100_v19 = vmax.bf16 %v298_v18, %v99_v17 }
  0xe5   :  { %284 = vmatmul.mubr.msk.bf16.vlgmr.msra.gmra.mrb[0].mxu1 %vm140_vm2, %v100_v19 }
 0x1b8   :  { %v178_v21 = vpop.f32.mrb[0].mxu1 }
 0x1b9   :  { %v179_v22 = vadd.f32 %v252_v20, %v178_v21  ;;  %v285_v23 = vpop.f32.mrb[1].mxu1 }
 0x1ba   :  { %v181_v24 = vpop.f32.mrb[2].mxu1 }
 0x1bb   :  { %v185_v26 = vmax.f32 %v179_v22, 0.0  ;;  %v182_v27 = vadd.f32 %v252_v20, %v181_v24  ;;  %v286_v28 = vpop.f32.mrb[3].mxu1 }
 0x1bd   :  { %v186_v29 = vmax.f32 %v182_v27, 0.0  ;;  %v194_v30 = vmul.f32 %v258_v25, %v185_v26 }
 0x1bf   :  { %v196_v31 = vsel %vm54_vm1, %v194_v30, 0.0  ;;  %v195_v32 = vmul.f32 %v258_v25, %v186_v29 }
 0x1c0   :  { %197 = vadd.xlane.f32.xlu0 %v196_v31 }
 0x1c1   :  { %v199_v33 = vsel %vm54_vm1, %v195_v32, 0.0 }
 0x1c4   :  { %200 = vadd.xlane.f32.xlu0 %v199_v33 }
 0x24d   :  { %v198_v35 = vpop.xlane.xlu0 %197 }
 0x24e   :  { %v204_v36 = vadd.f32 %v203_v34, %v198_v35 }
 0x250   :  { %207 = vst.msk [vmem:[#allocation3] sm:$0xff] %vm206_vm3, %v204_v36 }
 0x251   :  { %v201_v37 = vpop.xlane.xlu0 %200 }
 0x257   :  { %v226_v38 = vld [vmem:[#allocation3] sm:$0x3] }
 0x258   :  { %227 = vst [vmem:[%s388_s7] sm:$0x3] %v226_v38 }

</bundles_post_ra>
